<compile_context>
chip_gen: v6e
topology: v6e:2x2x1
jax: 0.10.0
libtpu: 0.0.40
codegen_flags: <defaults>
</compile_context>

<pallas_src>
import jax
import jax.numpy as jnp
from jax.experimental import pallas as pl
from jax.experimental.pallas import tpu as pltpu


def mlp_logsoftmax_kernel(x_ref, w1_ref, b1_ref, w2_ref, b2_ref,
                          w3_ref, b3_ref, out_ref):
    x = x_ref[...]                                            # (TB, 784) bf16

    # fc1 + ReLU  -> (TB, 128), f32 accumulation
    h1 = jnp.dot(x, w1_ref[...], preferred_element_type=jnp.float32) + b1_ref[...]
    h1 = jnp.maximum(h1, 0.0)

    # fc2 + ReLU  -> (TB, 64)
    h2 = jnp.dot(h1.astype(jnp.bfloat16), w2_ref[...],
                 preferred_element_type=jnp.float32) + b2_ref[...]
    h2 = jnp.maximum(h2, 0.0)

    # fc3 (logits) -> (TB, 26)
    logits = jnp.dot(h2.astype(jnp.bfloat16), w3_ref[...],
                     preferred_element_type=jnp.float32) + b3_ref[...]

    # LogSoftmax over dim=1 (numerically stable, f32)
    m = jnp.max(logits, axis=-1, keepdims=True)
    shifted = logits - m
    lse = jnp.log(jnp.sum(jnp.exp(shifted), axis=-1, keepdims=True))
    out_ref[...] = shifted - lse


def network_forward(x, params, *, tb=256):
    """x: (B, 784) float32.  params: (w1,b1,w2,b2,w3,b3) with W as (in,out)."""
    w1, b1, w2, b2, w3, b3 = params
    B = x.shape[0]

    # Per-step batch block: multiple of 8 (sublane), capped at `tb`
    # (256 rows = full MXU row occupancy on v6e/v7x; ~2.5 MB working set).
    TB = min(tb, max(8, ((B + 7) // 8) * 8))
    B_pad = ((B + TB - 1) // TB) * TB
    if B_pad != B:
        x = jnp.pad(x, ((0, B_pad - B), (0, 0)))

    # bf16 for the MXU inputs; biases stay f32.
    x_bf = x.astype(jnp.bfloat16)
    w1b = w1.astype(jnp.bfloat16)
    w2b = w2.astype(jnp.bfloat16)
    w3b = w3.astype(jnp.bfloat16)

    n_steps = B_pad // TB
    weight_bytes = (784 * 128 + 128 * 64 + 64 * 26) * 2 + (128 + 64 + 26) * 4
    cost = pl.CostEstimate(
        flops=2 * B_pad * (784 * 128 + 128 * 64 + 64 * 26),
        transcendentals=B_pad * 26,                          # exp in log-softmax
        bytes_accessed=B_pad * 784 * 2 + weight_bytes + B_pad * 26 * 4,
    )

    out = pl.pallas_call(
        mlp_logsoftmax_kernel,
        out_shape=jax.ShapeDtypeStruct((B_pad, 26), jnp.float32),
        grid=(n_steps,),
        in_specs=[
            pl.BlockSpec((TB, 784), lambda i: (i, 0)),       # streamed x tiles
            pl.BlockSpec((784, 128), lambda i: (0, 0)),      # weights stay resident
            pl.BlockSpec((1, 128), lambda i: (0, 0)),
            pl.BlockSpec((128, 64), lambda i: (0, 0)),
            pl.BlockSpec((1, 64), lambda i: (0, 0)),
            pl.BlockSpec((64, 26), lambda i: (0, 0)),
            pl.BlockSpec((1, 26), lambda i: (0, 0)),
        ],
        out_specs=pl.BlockSpec((TB, 26), lambda i: (i, 0)),
        compiler_params=pltpu.CompilerParams(
            dimension_semantics=("parallel",),               # 2 TCs on v7x
        ),
        cost_estimate=cost,
    )(x_bf, w1b, b1, w2b, b2, w3b, b3)

    return out[:B]


def init_params(key):
    """Deterministic init mimicking PyTorch Linear (uniform +/- 1/sqrt(fan_in)).
    Weights stored as (in, out) so the kernel does x @ W + b."""
    dims = [(784, 128), (128, 64), (64, 26)]
    params = []
    for (fan_in, fan_out) in dims:
        key, kw, kb = jax.random.split(key, 3)
        bound = 1.0 / jnp.sqrt(jnp.float32(fan_in))
        w = jax.random.uniform(kw, (fan_in, fan_out), jnp.float32, -bound, bound)
        b = jax.random.uniform(kb, (1, fan_out), jnp.float32, -bound, bound)
        params.extend([w, b])
    return tuple(params)


if __name__ == "__main__":
    key = jax.random.PRNGKey(0)
    key, kx = jax.random.split(key)

    B = 8
    x = jax.random.normal(kx, (B, 784), dtype=jnp.float32)
    params = init_params(key)

    out = network_forward(x, params)
    out = jax.block_until_ready(out)

    # sanity: log-softmax rows should exp-sum to ~1 (f32 softmax is self-normalizing)
    row_sums = jnp.sum(jnp.exp(out), axis=1)
    assert out.shape == (B, 26)
    assert bool(jnp.all(jnp.abs(row_sums - 1.0) < 1e-4))

    print("KERNEL_OK")
</pallas_src>

<mosaic_0001>
module attributes {stable_mosaic.version = 11 : i64} {
  func.func @mlp_logsoftmax_kernel(%arg0: i32, %arg1: memref<8x784xbf16, #tpu.memory_space<vmem>>, %arg2: memref<784x128xbf16, #tpu.memory_space<vmem>>, %arg3: memref<1x128xf32, #tpu.memory_space<vmem>>, %arg4: memref<128x64xbf16, #tpu.memory_space<vmem>>, %arg5: memref<1x64xf32, #tpu.memory_space<vmem>>, %arg6: memref<64x26xbf16, #tpu.memory_space<vmem>>, %arg7: memref<1x26xf32, #tpu.memory_space<vmem>>, %arg8: memref<8x26xf32, #tpu.memory_space<vmem>>) attributes {dimension_semantics = [#tpu.dimension_semantics<parallel>], iteration_bounds = array<i64: 1>, scalar_prefetch = 0 : i64, scratch_operands = 0 : i64, tpu.core_type = #tpu.core_type<tc>, window_params = [{transform_indices = @transform_0, window_bounds = array<i64: 8, 784>}, {pipeline_mode = #tpu.pipeline_mode<synchronous>, transform_indices = @transform_1, window_bounds = array<i64: 784, 128>}, {pipeline_mode = #tpu.pipeline_mode<synchronous>, transform_indices = @transform_2, window_bounds = array<i64: 1, 128>}, {pipeline_mode = #tpu.pipeline_mode<synchronous>, transform_indices = @transform_3, window_bounds = array<i64: 128, 64>}, {pipeline_mode = #tpu.pipeline_mode<synchronous>, transform_indices = @transform_4, window_bounds = array<i64: 1, 64>}, {pipeline_mode = #tpu.pipeline_mode<synchronous>, transform_indices = @transform_5, window_bounds = array<i64: 64, 26>}, {pipeline_mode = #tpu.pipeline_mode<synchronous>, transform_indices = @transform_6, window_bounds = array<i64: 1, 26>}, {transform_indices = @transform_7, window_bounds = array<i64: 8, 26>}]} {
    %c0 = arith.constant 0 : index
    %c0_0 = arith.constant 0 : index
    %0 = vector.load %arg1[%c0, %c0_0] : memref<8x784xbf16, #tpu.memory_space<vmem>>, vector<8x784xbf16>
    %c0_1 = arith.constant 0 : index
    %c0_2 = arith.constant 0 : index
    %1 = vector.load %arg2[%c0_1, %c0_2] : memref<784x128xbf16, #tpu.memory_space<vmem>>, vector<784x128xbf16>
    %cst = arith.constant dense<0.000000e+00> : vector<8x128xf32>
    %2 = tpu.matmul %0, %1, %cst {dimension_numbers = #tpu.dot_dimension_numbers<[1], [0], [0], [1], [0, 0, 1, 1], [], []>} : vector<8x784xbf16>, vector<784x128xbf16>, vector<8x128xf32> -> vector<8x128xf32>
    %c0_3 = arith.constant 0 : index
    %c0_4 = arith.constant 0 : index
    %3 = vector.load %arg3[%c0_3, %c0_4] : memref<1x128xf32, #tpu.memory_space<vmem>>, vector<1x128xf32>
    %4 = vector.broadcast %3 : vector<1x128xf32> to vector<8x128xf32>
    %5 = arith.addf %2, %4 : vector<8x128xf32>
    %cst_5 = arith.constant 0.000000e+00 : f32
    %6 = vector.broadcast %cst_5 : f32 to vector<8x128xf32>
    %7 = arith.maximumf %5, %6 : vector<8x128xf32>
    %8 = arith.truncf %7 : vector<8x128xf32> to vector<8x128xbf16>
    %c0_6 = arith.constant 0 : index
    %c0_7 = arith.constant 0 : index
    %9 = vector.load %arg4[%c0_6, %c0_7] : memref<128x64xbf16, #tpu.memory_space<vmem>>, vector<128x64xbf16>
    %cst_8 = arith.constant dense<0.000000e+00> : vector<8x64xf32>
    %10 = tpu.matmul %8, %9, %cst_8 {dimension_numbers = #tpu.dot_dimension_numbers<[1], [0], [0], [1], [0, 0, 1, 1], [], []>} : vector<8x128xbf16>, vector<128x64xbf16>, vector<8x64xf32> -> vector<8x64xf32>
    %c0_9 = arith.constant 0 : index
    %c0_10 = arith.constant 0 : index
    %11 = vector.load %arg5[%c0_9, %c0_10] : memref<1x64xf32, #tpu.memory_space<vmem>>, vector<1x64xf32>
    %12 = vector.broadcast %11 : vector<1x64xf32> to vector<8x64xf32>
    %13 = arith.addf %10, %12 : vector<8x64xf32>
    %cst_11 = arith.constant 0.000000e+00 : f32
    %14 = vector.broadcast %cst_11 : f32 to vector<8x64xf32>
    %15 = arith.maximumf %13, %14 : vector<8x64xf32>
    %16 = arith.truncf %15 : vector<8x64xf32> to vector<8x64xbf16>
    %c0_12 = arith.constant 0 : index
    %c0_13 = arith.constant 0 : index
    %17 = vector.load %arg6[%c0_12, %c0_13] : memref<64x26xbf16, #tpu.memory_space<vmem>>, vector<64x26xbf16>
    %cst_14 = arith.constant dense<0.000000e+00> : vector<8x26xf32>
    %18 = tpu.matmul %16, %17, %cst_14 {dimension_numbers = #tpu.dot_dimension_numbers<[1], [0], [0], [1], [0, 0, 1, 1], [], []>} : vector<8x64xbf16>, vector<64x26xbf16>, vector<8x26xf32> -> vector<8x26xf32>
    %c0_15 = arith.constant 0 : index
    %c0_16 = arith.constant 0 : index
    %19 = vector.load %arg7[%c0_15, %c0_16] : memref<1x26xf32, #tpu.memory_space<vmem>>, vector<1x26xf32>
    %20 = vector.broadcast %19 : vector<1x26xf32> to vector<8x26xf32>
    %21 = arith.addf %18, %20 : vector<8x26xf32>
    %cst_17 = arith.constant dense<0xFF800000> : vector<8xf32>
    %22 = vector.multi_reduction <maximumf>, %21, %cst_17 [1] : vector<8x26xf32> to vector<8xf32>
    %23 = vector.shape_cast %22 : vector<8xf32> to vector<8x1xf32>
    %24 = vector.broadcast %23 : vector<8x1xf32> to vector<8x26xf32>
    %25 = arith.subf %21, %24 : vector<8x26xf32>
    %26 = math.exp %25 : vector<8x26xf32>
    %cst_18 = arith.constant dense<0.000000e+00> : vector<8xf32>
    %27 = vector.multi_reduction <add>, %26, %cst_18 [1] : vector<8x26xf32> to vector<8xf32>
    %28 = vector.shape_cast %27 : vector<8xf32> to vector<8x1xf32>
    %29 = math.log %28 : vector<8x1xf32>
    %30 = vector.broadcast %29 : vector<8x1xf32> to vector<8x26xf32>
    %31 = arith.subf %25, %30 : vector<8x26xf32>
    %c0_19 = arith.constant 0 : index
    %c0_20 = arith.constant 0 : index
    %32 = vector.load %arg8[%c0_19, %c0_20] : memref<8x26xf32, #tpu.memory_space<vmem>>, vector<8x26xf32>
    tpu.vector_store %arg8[%c0_19, %c0_20], %31 {strides = array<i32>} : memref<8x26xf32, #tpu.memory_space<vmem>>, vector<8x26xf32>,
    return
  }
  func.func @transform_0(%arg0: i32) -> (i32, i32) {
    %c0_i32 = arith.constant 0 : i32
    %c0_i32_0 = arith.constant 0 : i32
    return %arg0, %c0_i32 : i32, i32
  }
  func.func @transform_1(%arg0: i32) -> (i32, i32) {
    %c0_i32 = arith.constant 0 : i32
    %c0_i32_0 = arith.constant 0 : i32
    %c0_i32_1 = arith.constant 0 : i32
    return %c0_i32, %c0_i32_0 : i32, i32
  }
  func.func @transform_2(%arg0: i32) -> (i32, i32) {
    %c0_i32 = arith.constant 0 : i32
    %c0_i32_0 = arith.constant 0 : i32
    %c0_i32_1 = arith.constant 0 : i32
    return %c0_i32, %c0_i32_0 : i32, i32
  }
  func.func @transform_3(%arg0: i32) -> (i32, i32) {
    %c0_i32 = arith.constant 0 : i32
    %c0_i32_0 = arith.constant 0 : i32
    %c0_i32_1 = arith.constant 0 : i32
    return %c0_i32, %c0_i32_0 : i32, i32
  }
  func.func @transform_4(%arg0: i32) -> (i32, i32) {
    %c0_i32 = arith.constant 0 : i32
    %c0_i32_0 = arith.constant 0 : i32
    %c0_i32_1 = arith.constant 0 : i32
    return %c0_i32, %c0_i32_0 : i32, i32
  }
  func.func @transform_5(%arg0: i32) -> (i32, i32) {
    %c0_i32 = arith.constant 0 : i32
    %c0_i32_0 = arith.constant 0 : i32
    %c0_i32_1 = arith.constant 0 : i32
    return %c0_i32, %c0_i32_0 : i32, i32
  }
  func.func @transform_6(%arg0: i32) -> (i32, i32) {
    %c0_i32 = arith.constant 0 : i32
    %c0_i32_0 = arith.constant 0 : i32
    %c0_i32_1 = arith.constant 0 : i32
    return %c0_i32, %c0_i32_0 : i32, i32
  }
  func.func @transform_7(%arg0: i32) -> (i32, i32) {
    %c0_i32 = arith.constant 0 : i32
    %c0_i32_0 = arith.constant 0 : i32
    return %arg0, %c0_i32 : i32, i32
  }
}

</mosaic_0001>

<bundles_post_ra>
// kernel: tpu_custom_call.1
= control target key start
LH: loop header
LB: loop body
LE: loop exit
PB: predicated region body
PF: predicated region fallthrough
CT: control target
= control target key end

     0   :  { %12 = vsyncpa [#allocation3], 0  ;;  %s1306_s0 = inlined_call_operand.vmem [shape: bf16[8,784], index: 0, kind: input, shape index: {}]   ;;  %s1307_s1 = inlined_call_operand.hbm [shape: bf16[784,128], index: 1, kind: input, shape index: {}]   ;;  %s1308_s2 = inlined_call_operand.vmem [shape: f32[1,128], index: 2, kind: input, shape index: {}]   ;;  %s1309_s3 = inlined_call_operand.vmem [shape: bf16[128,64], index: 3, kind: input, shape index: {}]   ;;  %s1310_s4 = inlined_call_operand.vmem [shape: f32[1,64], index: 4, kind: input, shape index: {}]   ;;  %s1311_s5 = inlined_call_operand.vmem [shape: bf16[64,26], index: 5, kind: input, shape index: {}]   ;;  %s1312_s6 = inlined_call_operand.vmem [shape: f32[1,26], index: 6, kind: input, shape index: {}]   ;;  %s1313_s7 = inlined_call_operand.hbm [shape: f32[8,26], index: 7, kind: output, shape index: {}]  }
   0x1   :  { %13 = vsyncpa [#allocation4], 0  ;;  %s1175_s24 = smov [#allocation2]  }
   0x2   :  { %s21_s25 = sshll.u32 %s1175_s24, 4  ;;  %s22_s25 = int_to_ptr.vmem [resolvable:$true] %s21_s25 }
   0x3   :  { %s1139_s26 = scalar_lea.vmem %s22_s25, 6272  ;;  %p1144_p1 = scmp.lt.s32.totalorder %s22_s25, %s22_s25 }
   0x4   :  { %p1140_p0 = scmp.ne.s32.totalorder %s22_s25, %s1139_s26  ;;  %p1145_p2 = scmp.lt.s32.totalorder %s1139_s26, %s1139_s26 }
   0x6   :  { %p1146_p3 = por %p1145_p2, %p1144_p1 }
   0x8   :  { %p1147_p4 = pnand %p1146_p3, %p1140_p0 }
   0xa   :  { %1150 = shalt.err (!%p1147_p4)
}
   0xb   :  { %s1176_s27 = smov 64   ;;  %s1177_s28 = smov 4  }
   0xc   :  { %27 = dma.hbm_to_vmem [thread:$0]  %s1307_s1, 6272, %s22_s25, [#allocation3], %s1176_s27, %s1176_s27, %s1177_s28  }
   0xd   :  { %1171 = dma.done.wait [#allocation3], 6272  }
   0xe   :  { %1172 = vsyncadd [#allocation3], 4294961024  ;;  %v1059_v0 = vld [vmem:[#allocation2 + $0x78] sm:$0xff]   ;;  %v1063_v4 = vld [vmem:[#allocation2 + $0x70] sm:$0xff]   ;;  %v1178_v43 = vmov 0.0   ;;  %vm1179_vm0 = vmmov 0  }
   0xf   :  { %v1060_v1 = vld [vmem:[#allocation2 + $0x38] sm:$0xff]   ;;  %933 = vmatprep.subr.bf16.mxu0 %v1059_v0  ;;  %v1064_v5 = vld [vmem:[#allocation2 + $0x30] sm:$0xff]   ;;  %v1067_v8 = vld [vmem:[#allocation2 + $0x68] sm:$0xff]   ;;  %vm469_vm1 = vcmask 130048   ;;  %vm787_vm2 = vcmask 523264   ;;  %vm831_vm3 = vcmask 211968  }
  0x10   :  { %v1061_v2 = vld [vmem:[#allocation2 + $0xf8] sm:$0xff]   ;;  %934 = vmatpush3.bf16.msra.mxu0 %v1060_v1  ;;  %v1065_v6 = vld [vmem:[#allocation2 + $0xf0] sm:$0xff]   ;;  %v1068_v9 = vld [vmem:[#allocation2 + $0x28] sm:$0xff]  }
  0x11   :  { %v1062_v3 = vld [vmem:[#allocation2 + $0xb8] sm:$0xff]   ;;  %955 = vmatprep.subr.bf16.mxu1 %v1061_v2  ;;  %935 = vmatprep.subr.bf16.mxu0 %v1063_v4  ;;  %v1066_v7 = vld [vmem:[#allocation2 + $0xb0] sm:$0xff]   ;;  %v1069_v10 = vld [vmem:[#allocation2 + $0xe8] sm:$0xff]  }
  0x12   :  { %956 = vmatpush3.bf16.msra.mxu1 %v1062_v3  ;;  %v1070_v11 = vld [vmem:[#allocation2 + $0xa8] sm:$0xff]   ;;  %v1071_v12 = vld [vmem:[#allocation2 + $0x60] sm:$0xff]   ;;  %v1075_v16 = vld [vmem:[#allocation2 + $0x58] sm:$0xff]  }
  0x13   :  { %957 = vmatprep.subr.bf16.mxu1 %v1065_v6  ;;  %v1072_v13 = vld [vmem:[#allocation2 + $0x20] sm:$0xff]   ;;  %v1076_v17 = vld [vmem:[#allocation2 + $0x18] sm:$0xff]   ;;  %v1079_v20 = vld [vmem:[#allocation2 + $0x50] sm:$0xff]  }
  0x14   :  { %936 = vmatpush3.bf16.msra.mxu0 %v1064_v5  ;;  %v1073_v14 = vld [vmem:[#allocation2 + $0xe0] sm:$0xff]   ;;  %v1077_v18 = vld [vmem:[#allocation2 + $0xd8] sm:$0xff]   ;;  %v1080_v21 = vld [vmem:[#allocation2 + $0x10] sm:$0xff]  }
  0x15   :  { %937 = vmatprep.subr.bf16.mxu0 %v1067_v8  ;;  %v1074_v15 = vld [vmem:[#allocation2 + $0xa0] sm:$0xff]   ;;  %v1078_v19 = vld [vmem:[#allocation2 + $0x98] sm:$0xff]   ;;  %v1081_v22 = vld [vmem:[#allocation2 + $0xd0] sm:$0xff]  }
  0x16   :  { %958 = vmatpush3.bf16.msra.mxu1 %v1066_v7  ;;  %v1082_v23 = vld [vmem:[#allocation2 + $0x90] sm:$0xff]   ;;  %v1083_v24 = vld [vmem:[#allocation2 + $0x48] sm:$0xff]   ;;  %v1087_v28 = vld [vmem:[#allocation2 + $0x40] sm:$0xff]  }
  0x17   :  { %959 = vmatprep.subr.bf16.mxu1 %v1069_v10  ;;  %v1084_v25 = vld [vmem:[#allocation2 + $0x8] sm:$0xff]   ;;  %v1088_v29 = vld [vmem:[#allocation2] sm:$0xff]   ;;  %v1093_v35 = vld [vmem:[#allocation2 + $0x178] sm:$0xff]  }
  0x18   :  { %938 = vmatpush3.bf16.msra.mxu0 %v1068_v9  ;;  %v1085_v26 = vld [vmem:[#allocation2 + $0xc8] sm:$0xff]   ;;  %v1089_v30 = vld [vmem:[#allocation2 + $0xc0] sm:$0xff]   ;;  %v1096_v39 = vld [vmem:[#allocation2 + $0x138] sm:$0xff]  }
  0x19   :  { %939 = vmatprep.subr.bf16.mxu0 %v1071_v12  ;;  %v1086_v27 = vld [vmem:[#allocation2 + $0x88] sm:$0xff]   ;;  %v42_v31 = vld [vmem:[%s1306_s0] sm:$0xff]  ;;  %v1097_v40 = vld [vmem:[#allocation2 + $0x170] sm:$0xff]  }
  0x1a   :  { %960 = vmatpush3.bf16.msra.mxu1 %v1070_v11  ;;  %v861_v32 = vcombine.low %v42_v31, %v42_v31  ;;  %v862_v33 = vcombine.high %v42_v31, %v42_v31  ;;  %v1092_v34 = vld [vmem:[#allocation2 + $0x80] sm:$0xff]   ;;  %v43_v36 = vld [vmem:[%s1306_s0 + $0x8] sm:$0xff]  ;;  %v1098_v41 = vld [vmem:[#allocation2 + $0x130] sm:$0xff]  }
  0x1b   :  { %961 = vmatprep.subr.bf16.mxu1 %v1073_v14  ;;  %v863_v37 = vcombine.low %v43_v36, %v43_v36  ;;  %v864_v38 = vcombine.high %v43_v36, %v43_v36  ;;  %v1099_v42 = vld [vmem:[#allocation2 + $0x168] sm:$0xff]   ;;  %v1101_v45 = vld [vmem:[#allocation2 + $0x160] sm:$0xff]   ;;  %v1103_v47 = vld [vmem:[#allocation2 + $0x158] sm:$0xff]  }
  0x1c   :  { %940 = vmatpush3.bf16.msra.mxu0 %v1072_v13  ;;  %505 = vmatprep.mubr.bf16.mxu0 %v862_v33  ;;  %v1100_v44 = vld [vmem:[#allocation2 + $0x128] sm:$0xff]   ;;  %v1102_v46 = vld [vmem:[#allocation2 + $0x120] sm:$0xff]   ;;  %v1104_v48 = vld [vmem:[#allocation2 + $0x118] sm:$0xff]  }
  0x1d   :  { %941 = vmatprep.subr.bf16.mxu0 %v1075_v16  ;;  %545 = vmatprep.mubr.bf16.mxu1 %v864_v38  ;;  %v1105_v49 = vld [vmem:[#allocation2 + $0x150] sm:$0xff]   ;;  %v1111_v50 = vld [vmem:[#allocation2 + $0x180] sm:$0xff]   ;;  %v1114_v54 = vld [vmem:[%s1306_s0 + $0x18] ss:$0 sps:$4 sm:$0xff]  }
  0x1e   :  { %962 = vmatpush3.bf16.msra.mxu1 %v1074_v15  ;;  %v44_v51 = vld [vmem:[%s1306_s0 + $0x10] sm:$0xff]  ;;  %v1107_v55 = vld [vmem:[#allocation2 + $0x148] sm:$0xff]   ;;  %v1109_v57 = vld [vmem:[#allocation2 + $0x140] sm:$0xff]  }
  0x1f   :  { %963 = vmatprep.subr.bf16.mxu1 %v1077_v18  ;;  %v1106_v52 = vld [vmem:[#allocation2 + $0x110] sm:$0xff]   ;;  %v866_v53 = vcombine.high %v44_v51, %v44_v51  ;;  %v1108_v56 = vld [vmem:[#allocation2 + $0x108] sm:$0xff]   ;;  %v1110_v58 = vld [vmem:[#allocation2 + $0x100] sm:$0xff]   ;;  %v865_v59 = vcombine.low %v44_v51, %v44_v51 }
  0x20   :  { %942 = vmatpush3.bf16.msra.mxu0 %v1076_v17  ;;  %v1115_v60 = vld [vmem:[%s1309_s3 + $0x38] sm:$0xff]   ;;  %v1116_v61 = vld [vmem:[%s1309_s3 + $0x30] sm:$0xff]   ;;  %v1117_v62 = vld [vmem:[%s1309_s3 + $0x28] sm:$0xff]  }
  0x21   :  { %943 = vmatprep.subr.bf16.mxu0 %v1079_v20  ;;  %v1118_v63 = vld [vmem:[%s1309_s3 + $0x20] sm:$0xff]   ;;  %v1119_v0 = vld [vmem:[%s1309_s3 + $0x18] sm:$0xff]   ;;  %v1120_v1 = vld [vmem:[%s1309_s3 + $0x10] sm:$0xff]  }
  0x22   :  { %964 = vmatpush3.bf16.msra.mxu1 %v1078_v19  ;;  %v1121_v2 = vld [vmem:[%s1309_s3 + $0x8] sm:$0xff]   ;;  %v1122_v3 = vld [vmem:[%s1309_s3] sm:$0xff]   ;;  %v1123_v4 = vld [vmem:[%s1311_s5 + $0x18] sm:$0xff]  }
  0x23   :  { %965 = vmatprep.subr.bf16.mxu1 %v1081_v22  ;;  %v1124_v5 = vld [vmem:[%s1311_s5 + $0x10] sm:$0xff]   ;;  %v860_v19 = vld [vmem:[%s1308_s2] ss:$0 sm:$0xff] }
  0x24   :  { %944 = vmatpush3.bf16.msra.mxu0 %v1080_v21  ;;  %v1126_v33 = vld [vmem:[%s1311_s5] sm:$0xff]  }
  0x25   :  { %945 = vmatprep.subr.bf16.mxu0 %v1083_v24 }
  0x26   :  { %966 = vmatpush3.bf16.msra.mxu1 %v1082_v23 }
  0x27   :  { %967 = vmatprep.subr.bf16.mxu1 %v1085_v26 }
  0x28   :  { %946 = vmatpush3.bf16.msra.mxu0 %v1084_v25 }
  0x29   :  { %947 = vmatprep.subr.bf16.mxu0 %v1087_v28 }
  0x2a   :  { %968 = vmatpush3.bf16.msra.mxu1 %v1086_v27 }
  0x2b   :  { %969 = vmatprep.subr.bf16.mxu1 %v1089_v30 }
  0x2c   :  { %948 = vmatpush3.bf16.msra.mxu0 %v1088_v29 }
  0x2d   :  { %977 = vmatprep.subr.bf16.mxu0 %v1093_v35 }
  0x2e   :  { %970 = vmatpush3.bf16.msra.mxu1 %v1092_v34  ;;  %v918_v34 = vld [vmem:[%s1310_s4] ss:$0 sm:$0xff]  ;;  %s1180_s4 = smov [#allocation5]  }
  0x2f   :  { %506 = vmatmul.mubr.bf16.vlgmr.msra.gmra.mxu0 %v861_v32  ;;  %1015 = vmatprep.subr.bf16.mxu1 %v1178_v43  ;;  %v1125_v32 = vld [vmem:[%s1311_s5 + $0x8] sm:$0xff]   ;;  %s851_s5 = sshll.u32 %s1180_s4, 4  ;;  %s852_s5 = int_to_ptr.vmem [resolvable:$true] %s851_s5 }
  0x30   :  { %978 = vmatpush3.bf16.msra.mxu0 %v1096_v39  ;;  %585 = vmatprep.mubr.bf16.mxu0 %v866_v53  ;;  %p1156_p6 = scmp.lt.s32.totalorder %s852_s5, %s852_s5 }
  0x31   :  { %546 = vmatmul.mubr.bf16.vlgmr.msra.gmra.mxu1 %v863_v37  ;;  %979 = vmatprep.subr.bf16.mxu0 %v1097_v40 }
  0x32   :  { %1017 = vmatprep.mubr.msk.bf16.mxu1 %vm1179_vm0, %v1178_v43  ;;  %1016 = vmatpush3.bf16.msra.mxu1 %v1111_v50 }
  0x33   :  { %1021 = vmatprep.subr.bf16.mxu1 %v1178_v43 }
  0x34   :  { %980 = vmatpush3.bf16.msra.mxu0 %v1098_v41 }
  0x35   :  { %981 = vmatprep.subr.bf16.mxu0 %v1099_v42  ;;  %v927_v42 = vld [vmem:[%s1312_s6] ss:$0 sm:$0xff]  ;;  %s1151_s6 = scalar_lea.vmem %s852_s5, 128 }
  0x36   :  { %p1152_p5 = scmp.ne.s32.totalorder %s852_s5, %s1151_s6  ;;  %p1157_p7 = scmp.lt.s32.totalorder %s1151_s6, %s1151_s6 }
  0x38   :  { %982 = vmatpush3.bf16.msra.mxu0 %v1100_v44  ;;  %p1158_p8 = por %p1157_p7, %p1156_p6 }
  0x39   :  { %983 = vmatprep.subr.bf16.mxu0 %v1101_v45  ;;  %1018 = vmatmul.mubr.msk.bf16.vlgmr.msra.gmra.mxu1 %vm469_vm1, %v1114_v54 }
  0x3a   :  { %1037 = vmatprep.mubr.msk.bf16.mxu1 %vm1179_vm0, %v1178_v43  ;;  %1022 = vmatpush3.bf16.msra.mxu1 %v1115_v60  ;;  %p1159_p9 = pnand %p1158_p8, %p1152_p5 }
  0x3b   :  { %1023 = vmatprep.subr.bf16.mxu1 %v1178_v43 }
  0x3c   :  { %984 = vmatpush3.bf16.msra.mxu0 %v1102_v46 }
  0x3d   :  { %985 = vmatprep.subr.bf16.mxu0 %v1103_v47 }
  0x3e   :  { %1024 = vmatpush3.bf16.msra.mxu1 %v1116_v61 }
  0x3f   :  { %1025 = vmatprep.subr.bf16.mxu1 %v1178_v43 }
  0x40   :  { %986 = vmatpush3.bf16.msra.mxu0 %v1104_v48 }
  0x41   :  { %987 = vmatprep.subr.bf16.mxu0 %v1105_v49 }
  0x42   :  { %1026 = vmatpush3.bf16.msra.mxu1 %v1117_v62 }
  0x43   :  { %1027 = vmatprep.subr.bf16.mxu1 %v1178_v43 }
  0x44   :  { %988 = vmatpush3.bf16.msra.mxu0 %v1106_v52 }
  0x45   :  { %989 = vmatprep.subr.bf16.mxu0 %v1107_v55 }
  0x46   :  { %1028 = vmatpush3.bf16.msra.mxu1 %v1118_v63 }
  0x47   :  { %1029 = vmatprep.subr.bf16.mxu1 %v1178_v43 }
  0x48   :  { %990 = vmatpush3.bf16.msra.mxu0 %v1108_v56 }
  0x49   :  { %991 = vmatprep.subr.bf16.mxu0 %v1109_v57 }
  0x4a   :  { %1030 = vmatpush3.bf16.msra.mxu1 %v1119_v0 }
  0x4b   :  { %1031 = vmatprep.subr.bf16.mxu1 %v1178_v43 }
  0x4c   :  { %992 = vmatpush3.bf16.msra.mxu0 %v1110_v58 }
  0x4d   :  { %1041 = vmatprep.subr.bf16.mxu0 %v1178_v43 }
  0x4e   :  { %1032 = vmatpush3.bf16.msra.mxu1 %v1120_v1 }
  0x4f   :  { %586 = vmatmul.mubr.bf16.vlgmr.msra.gmra.mxu0 %v865_v59  ;;  %1033 = vmatprep.subr.bf16.mxu1 %v1178_v43 }
  0x50   :  { %1049 = vmatprep.mubr.msk.bf16.mxu0 %vm1179_vm0, %v1178_v43  ;;  %1042 = vmatpush3.bf16.msra.mxu0 %v1123_v4 }
  0x51   :  { %1043 = vmatprep.subr.bf16.mxu0 %v1178_v43 }
  0x52   :  { %1034 = vmatpush3.bf16.msra.mxu1 %v1121_v2 }
  0x53   :  { %1035 = vmatprep.subr.bf16.mxu1 %v1178_v43 }
  0x54   :  { %1044 = vmatpush3.bf16.msra.mxu0 %v1124_v5 }
  0x55   :  { %1045 = vmatprep.subr.bf16.mxu0 %v1178_v43 }
  0x56   :  { %1036 = vmatpush3.bf16.msra.mxu1 %v1122_v3 }
  0x58   :  { %1046 = vmatpush3.bf16.msra.mxu0 %v1125_v32 }
  0x59   :  { %1047 = vmatprep.subr.bf16.mxu0 %v1178_v43 }
  0x5c   :  { %1048 = vmatpush3.bf16.msra.mxu0 %v1126_v33 }
  0xef   :  { %v949_v6 = vpop.f32.mrf.mxu0 }
  0xf1   :  { %v950_v7 = vpop.f32.mrf.mxu0  ;;  %v971_v8 = vpop.f32.mrf.mxu1 }
  0xf2   :  { %v951_v18 = vadd.f32 %v950_v7, %v949_v6 }
  0xf3   :  { %v952_v9 = vpop.f32.mrf.mxu0  ;;  %v972_v10 = vpop.f32.mrf.mxu1 }
  0xf4   :  { %v508_v20 = vadd.f32 %v951_v18, %v860_v19  ;;  %v973_v21 = vadd.f32 %v972_v10, %v971_v8 }
  0xf5   :  { %v953_v11 = vpop.f32.mrf.mxu0  ;;  %v974_v12 = vpop.f32.mrf.mxu1 }
  0xf6   :  { %v548_v24 = vadd.f32 %v973_v21, %v508_v20 }
  0xf7   :  { %v975_v13 = vpop.f32.mrf.mxu1 }
  0xf9   :  { %v627_v14 = vpop.f32.mrf.mxu1 }
  0xfb   :  { %v1019_v15 = vpop.f32.mrf.mxu1 }
  0xfd   :  { %v630_v16 = vpop.f32.mrf.mxu1 }
  0xff   :  { %v1020_v17 = vpop.f32.mrf.mxu1 }
 0x10f   :  { %v993_v22 = vpop.f32.mrf.mxu0 }
 0x111   :  { %v994_v23 = vpop.f32.mrf.mxu0 }
 0x112   :  { %v995_v25 = vadd.f32 %v994_v23, %v993_v22 }
 0x113   :  { %v996_v26 = vpop.f32.mrf.mxu0 }
 0x114   :  { %v588_v27 = vadd.f32 %v995_v25, %v548_v24 }
 0x115   :  { %v997_v28 = vpop.f32.mrf.mxu0 }
 0x116   :  { %v628_v29 = vadd.f32 %v627_v14, %v588_v27 }
 0x118   :  { %v633_v30 = vmax.f32 %v628_v29, 0.0 }
 0x11a   :  { %v634_v31 = vpack.c.bf16 %v633_v30, %v633_v30 }
 0x11c   :  { %1038 = vmatmul.mubr.bf16.vlgmr.msra.gmra.mxu1 %v634_v31 }
 0x1dc   :  { %v740_v35 = vpop.f32.mrf.mxu1 }
 0x1dd   :  { %v741_v36 = vadd.f32 %v918_v34, %v740_v35 }
 0x1de   :  { %v1039_v37 = vpop.f32.mrf.mxu1 }
 0x1df   :  { %v746_v38 = vmax.f32 %v741_v36, 0.0 }
 0x1e0   :  { %v743_v39 = vpop.f32.mrf.mxu1 }
 0x1e1   :  { %v747_v40 = vpack.c.bf16 %v746_v38, %v746_v38 }
 0x1e2   :  { %v1040_v41 = vpop.f32.mrf.mxu1 }
 0x1e3   :  { %1050 = vmatmul.mubr.msk.bf16.vlgmr.msra.gmra.mxu0 %vm787_vm2, %v747_v40 }
 0x2a3   :  { %v825_v43 = vpop.f32.mrf.mxu0 }
 0x2a4   :  { %v826_v44 = vadd.f32 %v927_v42, %v825_v43 }
 0x2a5   :  { %v1051_v45 = vpop.f32.mrf.mxu0 }
 0x2a6   :  { %v832_v46 = vsel %vm831_vm3, %v826_v44, -inf }
 0x2a7   :  { %833 = vmax.xlane.f32.xlu0 %v832_v46  ;;  %v828_v47 = vpop.f32.mrf.mxu0 }
 0x2a9   :  { %v1052_v48 = vpop.f32.mrf.mxu0 }
 0x330   :  { %v834_v49 = vpop.xlane.xlu0 %833 }
 0x331   :  { %v835_v50 = vsub.f32 %v826_v44, %v834_v49 }
 0x333   :  { %v836_v51 = vmul.f32 1.442695, %v835_v50 }
 0x335   :  { %1127 = vpow2.f32 %v836_v51 }
 0x342   :  { %v1128_v52 = vpop.eup %1127 }
 0x343   :  { %v838_v53 = vsel %vm831_vm3, %v1128_v52, 0.0 }
 0x344   :  { %839 = vadd.xlane.f32.xlu0 %v838_v53 }
 0x3cd   :  { %v840_v54 = vpop.xlane.xlu0 %839 }
 0x3ce   :  { %1129 = vlog2.f32 %v840_v54 }
 0x3db   :  { %v1130_v55 = vpop.eup %1129 }
 0x3dc   :  { %v842_v56 = vmul.f32 0.6931472, %v1130_v55 }
 0x3de   :  { %v843_v57 = vsub.f32 %v835_v50, %v842_v56 }
 0x3e0   :  { %844 = vst.msk [vmem:[#allocation5] sm:$0xff] %vm831_vm3, %v843_v57 }
 0x3e1   :  { %1162 = shalt.err (!%p1159_p9)
}
 0x3e2   :  { %854 = dma.vmem_to_hbm [thread:$0]  %s852_s5, 128, %s1313_s7, [#allocation4]  }
 0x3e3   :  { %1173 = dma.done.wait [#allocation4], 128  }
 0x3e4   :  { %1174 = vsyncadd [#allocation4], 4294967168 }
 0x3e5   :  { %858 = vsyncpa [#allocation3], 1 }
 0x3e6   :  { %859 = vsyncpa [#allocation4], 1 }

</bundles_post_ra>
